<compile_context>
chip_gen: v7x
topology: tpu7x:2x2x1
jax: 0.10.0
libtpu: 0.0.40
codegen_flags: <defaults>
</compile_context>

<pallas_src>
import functools
import math

import jax
import jax.numpy as jnp
from jax import lax
from jax.experimental import pallas as pl
from jax.experimental.pallas import tpu as pltpu


def _projection_kernel(x_ref, w_ref, b_ref, out_ref, acc_sum_ref, acc_g_ref, *,
                       inv_a, a_true, in_c_true, c_blk, ta, acc_ln,
                       needs_a_mask, needs_c_mask):
    """One grid step over an (in_c block, A tile).

    x_ref      : (B, c_blk, ta)   feature tile, NATIVE dtype
    w_ref      : (out_c, c_blk)   nn.Linear weight block (PyTorch layout)
    b_ref      : (1, out_c)       nn.Linear bias
    out_ref    : (B, B)           final similarity matrix (written on last step)
    acc_sum_ref: (B, c_blk, acc_ln) f32  deferred-reduction A accumulator
    acc_g_ref  : (B, out_c) f32   projected global-feature accumulator
    """
    ci = pl.program_id(0)
    ai = pl.program_id(1)
    n_c = pl.num_programs(0)
    n_a = pl.num_programs(1)

    @pl.when(jnp.logical_and(ci == 0, ai == 0))
    def _init_g():
        acc_g_ref[...] = jnp.zeros_like(acc_g_ref)

    @pl.when(ai == 0)
    def _init_sum():
        acc_sum_ref[...] = jnp.zeros_like(acc_sum_ref)

    # ---- streaming phase: cast-in-kernel + masked, chunk-wise VALU adds ----
    x = x_ref[...].astype(jnp.float32)                       # (B, c_blk, ta)
    if needs_a_mask:
        col = ai * ta + lax.broadcasted_iota(jnp.int32, x.shape, 2)
        x = jnp.where(col < a_true, x, 0.0)
    if needs_c_mask:
        row = ci * c_blk + lax.broadcasted_iota(jnp.int32, x.shape, 1)
        x = jnp.where(row < in_c_true, x, 0.0)

    # Fold the tile into the 128-lane accumulator: static lane-aligned slices
    # + VALU adds only (no per-step cross-lane XLU reduce).
    part = x[:, :, 0:acc_ln]
    for ch in range(1, ta // acc_ln):
        part = part + x[:, :, ch * acc_ln:(ch + 1) * acc_ln]
    acc_sum_ref[...] += part

    # ---- per-in_c-block finalize: one lane reduce + partial Linear (MXU) ----
    @pl.when(ai == n_a - 1)
    def _fold_block():
        s = jnp.sum(acc_sum_ref[...], axis=2) * inv_a        # (B, c_blk) mean
        wblk = w_ref[...]                                     # (out_c, c_blk)
        if needs_c_mask:
            wcol = ci * c_blk + lax.broadcasted_iota(jnp.int32, wblk.shape, 1)
            wblk = jnp.where(wcol < in_c_true, wblk, 0.0)
        # g += mean_block @ W_block^T  (NT contraction, no transpose)
        acc_g_ref[...] += lax.dot_general(
            s, wblk, (((1,), (1,)), ((), ())),
            preferred_element_type=jnp.float32)               # (B, out_c)

    # ---- global finalize: tiny O(B*out_c + B*B) epilogue ----
    @pl.when(jnp.logical_and(ci == n_c - 1, ai == n_a - 1))
    def _finalize():
        g = acc_g_ref[...] + b_ref[...]                       # (B, out_c)
        # F.normalize(dim=1): g / max(||g||, 1e-12) == g * rsqrt(max(||g||^2, 1e-24))
        ss = jnp.sum(g * g, axis=1, keepdims=True)
        gn = g * lax.rsqrt(jnp.maximum(ss, 1e-24))
        # cosine-similarity matrix (NT matmul, no transpose materialized)
        sim = lax.dot_general(gn, gn, (((1,), (1,)), ((), ())),
                              preferred_element_type=jnp.float32)   # (B, B)
        # PairwiseDistance(p=2, eps=1e-6) against zero: ||gn + 1e-6||_2
        sq = (gn + 1e-6) ** 2
        d_col = jnp.sqrt(jnp.sum(sq, axis=1, keepdims=True))        # (B, 1)
        ones_row = jnp.ones((1, sq.shape[1]), jnp.float32)
        d_row = jnp.sqrt(lax.dot_general(ones_row, sq, (((1,), (1,)), ((), ())),
                                         preferred_element_type=jnp.float32))  # (1, B)
        deno = jnp.maximum(jnp.maximum(d_col, d_row), 1e-8)
        out_ref[...] = sim / deno


def _vmem_limit_bytes():
    """Generation-aware scoped-VMEM limit (~75% of physical)."""
    try:
        phys = pltpu.get_tpu_info().vmem_capacity_bytes
    except Exception:
        phys = 64 << 20            # conservative: v7x has the smallest VMEM
    return int(min(phys * 3 // 4, 100 << 20))


def _pick_tiles(b, in_c, out_c, a, itemsize, vmem_limit, tile_a_cap, c_blk_cap):
    """Choose the in_c block (c_blk) and the A tile (ta) from the VMEM budget."""
    acc_ln = 128 if a >= 128 else a       # lane width of the deferred accumulator
    min_ta = 128 if a >= 128 else a

    # Grid-invariant small buffers (f32): out (x2), bias (x2), g-accumulator.
    small = 4 * (2 * b * b + 2 * out_c + b * out_c)
    budget = vmem_limit - small - (2 << 20)   # ~2 MiB headroom

    def fixed_cost(cb):                   # acc_sum scratch + double-buffered weight
        return 4 * b * cb * acc_ln + 2 * 4 * out_c * cb

    def col_cost(cb):                     # double-buffered feature bytes per A column
        return 2 * b * cb * itemsize

    # Prefer keeping the whole in_c extent resident; otherwise tile in_c in
    # 128-row blocks (keeps the weight block's last dim lane-aligned).
    if fixed_cost(in_c) + col_cost(in_c) * min_ta <= budget:
        c_blk = in_c
    else:
        c_blk = 128
        while (c_blk + 128 < in_c and
               fixed_cost(c_blk + 128) + col_cost(c_blk + 128) * min_ta <= budget):
            c_blk += 128
        c_blk = min(c_blk, in_c)
    if c_blk_cap is not None and c_blk_cap < c_blk:
        c_blk = in_c if c_blk_cap >= in_c else max(128, (c_blk_cap // 128) * 128)
        c_blk = min(c_blk, in_c)

    if a < 128:
        ta = a                            # full extent (lane dim == array dim)
    else:
        avail = budget - fixed_cost(c_blk)
        ta = max(min_ta, (avail // max(col_cost(c_blk), 1)) // 128 * 128)
        cap40 = int(0.4 * vmem_limit) // max(b * c_blk * itemsize, 1)
        ta = min(ta, max(128, cap40 // 128 * 128))   # <=40% of limit per buffer
        ta = min(ta, -(-a // 128) * 128)             # never exceed ceil(A/128)*128
        if tile_a_cap is not None:
            ta = min(ta, max(128, (tile_a_cap // 128) * 128))
    return c_blk, ta, acc_ln


def projection_layer_forward(features, weight=None, bias=None, *,
                             tile_a_cap=None, c_blk_cap=None):
    """features: (B, in_c, A), any float dtype (streamed natively).
    weight (out_c, in_c) / bias (out_c,) are the nn.Linear params (if_proj=True).
    Pass weight=None for the if_proj=False path (identity projection, zero bias).
    tile_a_cap / c_blk_cap are optional tuning/test knobs."""
    b, in_c, a = features.shape
    if weight is None:
        weight = jnp.eye(in_c, dtype=jnp.float32)
        bias = jnp.zeros((in_c,), jnp.float32)
    out_c = weight.shape[0]

    # Weight/bias are tiny: cast once.  Features stay in their native dtype.
    w = weight.astype(jnp.float32)
    b2 = bias.reshape(1, out_c).astype(jnp.float32)
    itemsize = features.dtype.itemsize

    vmem_limit = _vmem_limit_bytes()
    c_blk, ta, acc_ln = _pick_tiles(b, in_c, out_c, a, itemsize, vmem_limit,
                                    tile_a_cap, c_blk_cap)
    n_c = -(-in_c // c_blk)
    n_a = -(-a // ta)
    needs_a_mask = (n_a * ta != a)
    needs_c_mask = (n_c * c_blk != in_c)

    kernel = functools.partial(
        _projection_kernel,
        inv_a=1.0 / a, a_true=a, in_c_true=in_c, c_blk=c_blk, ta=ta,
        acc_ln=acc_ln, needs_a_mask=needs_a_mask, needs_c_mask=needs_c_mask)

    cost = pl.CostEstimate(
        flops=b * in_c * a + 2 * b * in_c * out_c + 4 * b * b * out_c,
        transcendentals=3 * b,
        bytes_accessed=itemsize * b * in_c * a
                       + 4 * (out_c * in_c + out_c + b * b))

    return pl.pallas_call(
        kernel,
        out_shape=jax.ShapeDtypeStruct((b, b), jnp.float32),
        grid_spec=pltpu.PrefetchScalarGridSpec(
            num_scalar_prefetch=0,
            grid=(n_c, n_a),
            in_specs=[
                pl.BlockSpec((b, c_blk, ta), lambda c, k: (0, c, k)),
                pl.BlockSpec((out_c, c_blk), lambda c, k: (0, c)),
                pl.BlockSpec((1, out_c), lambda c, k: (0, 0)),
            ],
            out_specs=pl.BlockSpec((b, b), lambda c, k: (0, 0)),
            scratch_shapes=[
                pltpu.VMEM((b, c_blk, acc_ln), jnp.float32),  # deferred A-sum
                pltpu.VMEM((b, out_c), jnp.float32),          # projected g acc
            ],
        ),
        compiler_params=pltpu.CompilerParams(
            dimension_semantics=("arbitrary", "arbitrary"),
            vmem_limit_bytes=vmem_limit,
        ),
        cost_estimate=cost,
    )(features, w, b2)


def _reference(features, weight, bias):
    """Pure-JAX reference mirroring the PyTorch ProjectionLayer forward."""
    g = jnp.mean(features.astype(jnp.float32), axis=2)
    g = g @ weight.T + bias
    norm = jnp.sqrt(jnp.sum(g * g, axis=1, keepdims=True))
    gn = g / jnp.maximum(norm, 1e-12)
    sim = gn @ gn.T
    dist = jnp.sqrt(jnp.sum((gn + 1e-6) ** 2, axis=1))
    deno = jnp.maximum(jnp.maximum(dist[:, None], dist[None, :]), 1e-8)
    return sim / deno


if __name__ == "__main__":
    B, IN_C, A, OUT_C = 2, 32, 64, 16

    key = jax.random.PRNGKey(0)
    kx, kw, kb, kx2 = jax.random.split(key, 4)

    features = jax.random.normal(kx, (B, IN_C, A), dtype=jnp.float32)
    bound = 1.0 / math.sqrt(IN_C)           # nn.Linear default init range
    weight = jax.random.uniform(kw, (OUT_C, IN_C), minval=-bound, maxval=bound,
                                dtype=jnp.float32)
    bias = jax.random.uniform(kb, (OUT_C,), minval=-bound, maxval=bound,
                              dtype=jnp.float32)

    # 1) if_proj=True path (f32 features)
    out = jax.block_until_ready(projection_layer_forward(features, weight, bias))
    ref = _reference(features, weight, bias)
    assert out.shape == (B, B)
    assert jnp.allclose(out, ref, atol=2e-3, rtol=2e-3), (out, ref)

    # 2) if_proj=False path (identity projection, zero bias)
    out2 = jax.block_until_ready(projection_layer_forward(features))
    ref2 = _reference(features, jnp.eye(IN_C, dtype=jnp.float32),
                      jnp.zeros((IN_C,), jnp.float32))
    assert jnp.allclose(out2, ref2, atol=2e-3, rtol=2e-3), (out2, ref2)

    # 3) native-dtype (bf16) streaming path
    fbf = features.astype(jnp.bfloat16)
    out3 = jax.block_until_ready(projection_layer_forward(fbf, weight, bias))
    ref3 = _reference(fbf, weight, bias)
    assert jnp.allclose(out3, ref3, atol=2e-2, rtol=2e-2), (out3, ref3)

    # 4) ragged A tail + in_c tiling path (exercises in-kernel masks, the
    #    multi-chunk deferred accumulation and the per-block partial Linear)
    IN_C2, A2 = 160, 300
    f2 = jax.random.normal(kx2, (B, IN_C2, A2), dtype=jnp.float32)
    bound2 = 1.0 / math.sqrt(IN_C2)
    w2 = jax.random.uniform(kw, (OUT_C, IN_C2), minval=-bound2, maxval=bound2,
                            dtype=jnp.float32)
    out4 = jax.block_until_ready(
        projection_layer_forward(f2, w2, bias, tile_a_cap=256, c_blk_cap=128))
    ref4 = _reference(f2, w2, bias)
    assert jnp.allclose(out4, ref4, atol=2e-3, rtol=2e-3), (out4, ref4)

    print("KERNEL_OK")
</pallas_src>

<mosaic_0001>
module attributes {stable_mosaic.version = 11 : i64} {
  func.func @_projection_kernel(%arg0: i32, %arg1: i32, %arg2: memref<2x32x64xf32, #tpu.memory_space<vmem>>, %arg3: memref<16x32xf32, #tpu.memory_space<vmem>>, %arg4: memref<1x16xf32, #tpu.memory_space<vmem>>, %arg5: memref<2x2xf32, #tpu.memory_space<vmem>>, %arg6: memref<2x32x64xf32, #tpu.memory_space<vmem>>, %arg7: memref<2x16xf32, #tpu.memory_space<vmem>>) attributes {dimension_semantics = [#tpu.dimension_semantics<arbitrary>, #tpu.dimension_semantics<arbitrary>], iteration_bounds = array<i64: 1, 1>, scalar_prefetch = 0 : i64, scratch_operands = 2 : i64, tpu.core_type = #tpu.core_type<tc>, window_params = [{transform_indices = @transform_0, window_bounds = array<i64: 2, 32, 64>}, {transform_indices = @transform_1, window_bounds = array<i64: 16, 32>}, {pipeline_mode = #tpu.pipeline_mode<synchronous>, transform_indices = @transform_2, window_bounds = array<i64: 1, 16>}, {pipeline_mode = #tpu.pipeline_mode<synchronous>, transform_indices = @transform_3, window_bounds = array<i64: 2, 2>}]} {
    %c0_i32 = arith.constant 0 : i32
    %0 = arith.cmpi eq, %arg0, %c0_i32 : i32
    %c0_i32_0 = arith.constant 0 : i32
    %1 = arith.cmpi eq, %arg1, %c0_i32_0 : i32
    %2 = arith.andi %0, %1 : i1
    %3 = arith.extui %2 : i1 to i32
    %c0_i32_1 = arith.constant 0 : i32
    %4 = arith.cmpi ne, %3, %c0_i32_1 : i32
    scf.if %4 {
      %cst = arith.constant 0.000000e+00 : f32
      %20 = vector.broadcast %cst : f32 to vector<2x16xf32>
      %c0_17 = arith.constant 0 : index
      %c0_18 = arith.constant 0 : index
      %21 = vector.load %arg7[%c0_17, %c0_18] : memref<2x16xf32, #tpu.memory_space<vmem>>, vector<2x16xf32>
      tpu.vector_store %arg7[%c0_17, %c0_18], %20 {strides = array<i32>} : memref<2x16xf32, #tpu.memory_space<vmem>>, vector<2x16xf32>,
    } else {
    }
    %c0_i32_2 = arith.constant 0 : i32
    %5 = arith.cmpi eq, %arg1, %c0_i32_2 : i32
    %6 = arith.extui %5 : i1 to i32
    %c0_i32_3 = arith.constant 0 : i32
    %7 = arith.cmpi ne, %6, %c0_i32_3 : i32
    scf.if %7 {
      %cst = arith.constant 0.000000e+00 : f32
      %20 = vector.broadcast %cst : f32 to vector<2x32x64xf32>
      %c0_17 = arith.constant 0 : index
      %c0_18 = arith.constant 0 : index
      %c0_19 = arith.constant 0 : index
      %21 = vector.load %arg6[%c0_17, %c0_18, %c0_19] : memref<2x32x64xf32, #tpu.memory_space<vmem>>, vector<2x32x64xf32>
      tpu.vector_store %arg6[%c0_17, %c0_18, %c0_19], %20 {strides = array<i32>} : memref<2x32x64xf32, #tpu.memory_space<vmem>>, vector<2x32x64xf32>,
    } else {
    }
    %c0 = arith.constant 0 : index
    %c0_4 = arith.constant 0 : index
    %c0_5 = arith.constant 0 : index
    %8 = vector.load %arg2[%c0, %c0_4, %c0_5] : memref<2x32x64xf32, #tpu.memory_space<vmem>>, vector<2x32x64xf32>
    %c0_6 = arith.constant 0 : index
    %c0_7 = arith.constant 0 : index
    %c0_8 = arith.constant 0 : index
    %9 = vector.load %arg6[%c0_6, %c0_7, %c0_8] : memref<2x32x64xf32, #tpu.memory_space<vmem>>, vector<2x32x64xf32>
    %10 = arith.addf %9, %8 : vector<2x32x64xf32>
    %c0_9 = arith.constant 0 : index
    %c0_10 = arith.constant 0 : index
    %c0_11 = arith.constant 0 : index
    %11 = vector.load %arg6[%c0_9, %c0_10, %c0_11] : memref<2x32x64xf32, #tpu.memory_space<vmem>>, vector<2x32x64xf32>
    tpu.vector_store %arg6[%c0_9, %c0_10, %c0_11], %10 {strides = array<i32>} : memref<2x32x64xf32, #tpu.memory_space<vmem>>, vector<2x32x64xf32>,
    %c0_i32_12 = arith.constant 0 : i32
    %12 = arith.cmpi eq, %arg1, %c0_i32_12 : i32
    %13 = arith.extui %12 : i1 to i32
    %c0_i32_13 = arith.constant 0 : i32
    %14 = arith.cmpi ne, %13, %c0_i32_13 : i32
    scf.if %14 {
      %c0_17 = arith.constant 0 : index
      %c0_18 = arith.constant 0 : index
      %c0_19 = arith.constant 0 : index
      %20 = vector.load %arg6[%c0_17, %c0_18, %c0_19] : memref<2x32x64xf32, #tpu.memory_space<vmem>>, vector<2x32x64xf32>
      %cst = arith.constant dense<0.000000e+00> : vector<2x32xf32>
      %21 = vector.multi_reduction <add>, %20, %cst [2] : vector<2x32x64xf32> to vector<2x32xf32>
      %cst_20 = arith.constant 1.562500e-02 : f32
      %22 = vector.broadcast %cst_20 : f32 to vector<2x32xf32>
      %23 = arith.mulf %21, %22 : vector<2x32xf32>
      %c0_21 = arith.constant 0 : index
      %c0_22 = arith.constant 0 : index
      %24 = vector.load %arg3[%c0_21, %c0_22] : memref<16x32xf32, #tpu.memory_space<vmem>>, vector<16x32xf32>
      %c0_23 = arith.constant 0 : index
      %c0_24 = arith.constant 0 : index
      %25 = vector.load %arg7[%c0_23, %c0_24] : memref<2x16xf32, #tpu.memory_space<vmem>>, vector<2x16xf32>
      %cst_25 = arith.constant dense<0.000000e+00> : vector<2x16xf32>
      %26 = tpu.matmul %23, %24, %cst_25 {dimension_numbers = #tpu.dot_dimension_numbers<[1], [1], [0], [0], [0, 0, 1, 0], [], []>} : vector<2x32xf32>, vector<16x32xf32>, vector<2x16xf32> -> vector<2x16xf32>
      %27 = arith.addf %25, %26 : vector<2x16xf32>
      %c0_26 = arith.constant 0 : index
      %c0_27 = arith.constant 0 : index
      %28 = vector.load %arg7[%c0_26, %c0_27] : memref<2x16xf32, #tpu.memory_space<vmem>>, vector<2x16xf32>
      tpu.vector_store %arg7[%c0_26, %c0_27], %27 {strides = array<i32>} : memref<2x16xf32, #tpu.memory_space<vmem>>, vector<2x16xf32>,
    } else {
    }
    %c0_i32_14 = arith.constant 0 : i32
    %15 = arith.cmpi eq, %arg0, %c0_i32_14 : i32
    %c0_i32_15 = arith.constant 0 : i32
    %16 = arith.cmpi eq, %arg1, %c0_i32_15 : i32
    %17 = arith.andi %15, %16 : i1
    %18 = arith.extui %17 : i1 to i32
    %c0_i32_16 = arith.constant 0 : i32
    %19 = arith.cmpi ne, %18, %c0_i32_16 : i32
    scf.if %19 {
      %c0_17 = arith.constant 0 : index
      %c0_18 = arith.constant 0 : index
      %20 = vector.load %arg7[%c0_17, %c0_18] : memref<2x16xf32, #tpu.memory_space<vmem>>, vector<2x16xf32>
      %c0_19 = arith.constant 0 : index
      %c0_20 = arith.constant 0 : index
      %21 = vector.load %arg4[%c0_19, %c0_20] : memref<1x16xf32, #tpu.memory_space<vmem>>, vector<1x16xf32>
      %22 = vector.broadcast %21 : vector<1x16xf32> to vector<2x16xf32>
      %23 = arith.addf %20, %22 : vector<2x16xf32>
      %24 = arith.mulf %23, %23 : vector<2x16xf32>
      %cst = arith.constant dense<0.000000e+00> : vector<2xf32>
      %25 = vector.multi_reduction <add>, %24, %cst [1] : vector<2x16xf32> to vector<2xf32>
      %26 = vector.shape_cast %25 : vector<2xf32> to vector<2x1xf32>
      %cst_21 = arith.constant 1.000000e-24 : f32
      %27 = vector.broadcast %cst_21 : f32 to vector<2x1xf32>
      %28 = arith.maximumf %26, %27 : vector<2x1xf32>
      %29 = math.rsqrt %28 : vector<2x1xf32>
      %30 = vector.broadcast %29 : vector<2x1xf32> to vector<2x16xf32>
      %31 = arith.mulf %23, %30 : vector<2x16xf32>
      %cst_22 = arith.constant dense<0.000000e+00> : vector<2x2xf32>
      %32 = tpu.matmul %31, %31, %cst_22 {dimension_numbers = #tpu.dot_dimension_numbers<[1], [1], [0], [0], [0, 0, 1, 0], [], []>} : vector<2x16xf32>, vector<2x16xf32>, vector<2x2xf32> -> vector<2x2xf32>
      %cst_23 = arith.constant 9.99999997E-7 : f32
      %33 = vector.broadcast %cst_23 : f32 to vector<2x16xf32>
      %34 = arith.addf %31, %33 : vector<2x16xf32>
      %35 = arith.mulf %34, %34 : vector<2x16xf32>
      %cst_24 = arith.constant dense<0.000000e+00> : vector<2xf32>
      %36 = vector.multi_reduction <add>, %35, %cst_24 [1] : vector<2x16xf32> to vector<2xf32>
      %37 = vector.shape_cast %36 : vector<2xf32> to vector<2x1xf32>
      %38 = math.sqrt %37 : vector<2x1xf32>
      %cst_25 = arith.constant 1.000000e+00 : f32
      %39 = vector.broadcast %cst_25 : f32 to vector<1x16xf32>
      %cst_26 = arith.constant dense<0.000000e+00> : vector<1x2xf32>
      %40 = tpu.matmul %39, %35, %cst_26 {dimension_numbers = #tpu.dot_dimension_numbers<[1], [1], [0], [0], [0, 0, 1, 0], [], []>} : vector<1x16xf32>, vector<2x16xf32>, vector<1x2xf32> -> vector<1x2xf32>
      %41 = math.sqrt %40 : vector<1x2xf32>
      %42 = vector.broadcast %38 : vector<2x1xf32> to vector<2x2xf32>
      %43 = vector.broadcast %41 : vector<1x2xf32> to vector<2x2xf32>
      %44 = arith.maximumf %42, %43 : vector<2x2xf32>
      %cst_27 = arith.constant 9.99999993E-9 : f32
      %45 = vector.broadcast %cst_27 : f32 to vector<2x2xf32>
      %46 = arith.maximumf %44, %45 : vector<2x2xf32>
      %47 = arith.divf %32, %46 : vector<2x2xf32>
      %c0_28 = arith.constant 0 : index
      %c0_29 = arith.constant 0 : index
      %48 = vector.load %arg5[%c0_28, %c0_29] : memref<2x2xf32, #tpu.memory_space<vmem>>, vector<2x2xf32>
      tpu.vector_store %arg5[%c0_28, %c0_29], %47 {strides = array<i32>} : memref<2x2xf32, #tpu.memory_space<vmem>>, vector<2x2xf32>,
    } else {
    }
    return
  }
  func.func @transform_0(%arg0: i32, %arg1: i32) -> (i32, i32, i32) {
    %c0_i32 = arith.constant 0 : i32
    %c0_i32_0 = arith.constant 0 : i32
    return %c0_i32, %arg0, %arg1 : i32, i32, i32
  }
  func.func @transform_1(%arg0: i32, %arg1: i32) -> (i32, i32) {
    %c0_i32 = arith.constant 0 : i32
    %c0_i32_0 = arith.constant 0 : i32
    return %c0_i32, %arg0 : i32, i32
  }
  func.func @transform_2(%arg0: i32, %arg1: i32) -> (i32, i32) {
    %c0_i32 = arith.constant 0 : i32
    %c0_i32_0 = arith.constant 0 : i32
    %c0_i32_1 = arith.constant 0 : i32
    return %c0_i32, %c0_i32_0 : i32, i32
  }
  func.func @transform_3(%arg0: i32, %arg1: i32) -> (i32, i32) {
    %c0_i32 = arith.constant 0 : i32
    %c0_i32_0 = arith.constant 0 : i32
    %c0_i32_1 = arith.constant 0 : i32
    return %c0_i32, %c0_i32_0 : i32, i32
  }
}

</mosaic_0001>

<bundles_post_ra>
// kernel: tpu_custom_call.1
= control target key start
LH: loop header
LB: loop body
LE: loop exit
PB: predicated region body
PF: predicated region fallthrough
CT: control target
= control target key end

     0   :  { %8 = vsyncpa [#allocation5], 0  ;;  %s744_s0 = inlined_call_operand.hbm [shape: f32[2,32,64], index: 0, kind: input, shape index: {}]   ;;  %s745_s1 = inlined_call_operand.hbm [shape: f32[16,32], index: 1, kind: input, shape index: {}]   ;;  %s746_s2 = inlined_call_operand.vmem [shape: f32[1,16], index: 2, kind: input, shape index: {}]   ;;  %s747_s3 = inlined_call_operand.hbm [shape: f32[2,2], index: 3, kind: output, shape index: {}]  }
   0x1   :  { %9 = vsyncpa [#allocation8], 0 }
   0x2   :  { %10 = vsyncpa [#allocation6], 0  ;;  %s619_s12 = smov [#allocation4]   ;;  %s547_s16 = scalar_lea.hbm %s744_s0, 1024 }
   0x3   :  { %s16_s13 = sshll.u32 %s619_s12, 4  ;;  %p548_p0 = scmp.ne.s32.totalorder %s744_s0, %s547_s16  ;;  %s17_s13 = int_to_ptr.vmem [resolvable:$true] %s16_s13 }
   0x4   :  { %p551_p1 = scmp.lt.u32.totalorder %s547_s16, %s744_s0 }
   0x6   :  { %p553_p2 = pnand %p551_p1, %p548_p0 }
   0x8   :  { %556 = shalt.err (!%p553_p2)
}
   0x9   :  { %s557_s21 = scalar_lea.vmem %s17_s13, 1024  ;;  %p562_p4 = scmp.lt.s32.totalorder %s17_s13, %s17_s13 }
   0xa   :  { %p558_p3 = scmp.ne.s32.totalorder %s17_s13, %s557_s21  ;;  %p563_p5 = scmp.lt.s32.totalorder %s557_s21, %s557_s21 }
   0xc   :  { %p564_p6 = por %p563_p5, %p562_p4 }
   0xe   :  { %p565_p7 = pnand %p564_p6, %p558_p3 }
  0x10   :  { %568 = shalt.err (!%p565_p7)
}
  0x11   :  { %s620_s22 = smov 128   ;;  %s621_s23 = smov 8  }
  0x12   :  { %22 = dma.hbm_to_vmem [thread:$0]  %s744_s0, 1024, %s17_s13, [#allocation5], %s620_s22, %s620_s22, %s621_s23  }
  0x13   :  { %s622_s26 = smov [#allocation7]   ;;  %s569_s30 = scalar_lea.hbm %s745_s1, 256 }
  0x14   :  { %s28_s27 = sshll.u32 %s622_s26, 4  ;;  %p570_p8 = scmp.ne.s32.totalorder %s745_s1, %s569_s30  ;;  %s29_s27 = int_to_ptr.vmem [resolvable:$true] %s28_s27 }
  0x15   :  { %p573_p9 = scmp.lt.u32.totalorder %s569_s30, %s745_s1 }
  0x17   :  { %p575_p10 = pnand %p573_p9, %p570_p8 }
  0x19   :  { %578 = shalt.err (!%p575_p10)
}
  0x1a   :  { %s579_s8 = scalar_lea.vmem %s29_s27, 256  ;;  %p584_p12 = scmp.lt.s32.totalorder %s29_s27, %s29_s27 }
  0x1b   :  { %p580_p11 = scmp.ne.s32.totalorder %s29_s27, %s579_s8  ;;  %p585_p13 = scmp.lt.s32.totalorder %s579_s8, %s579_s8 }
  0x1d   :  { %p586_p0 = por %p585_p13, %p584_p12 }
  0x1f   :  { %p587_p1 = pnand %p586_p0, %p580_p11 }
  0x21   :  { %590 = shalt.err (!%p587_p1)
}
  0x22   :  { %34 = dma.hbm_to_vmem [thread:$0]  %s745_s1, 256, %s29_s27, [#allocation8], %s620_s22, %s620_s22, %s621_s23  }
  0x23   :  { %613 = dma.done.wait [#allocation5], 1024  }
  0x24   :  { %614 = vsyncadd [#allocation5], 4294966272 }
  0x25   :  { %615 = dma.done.wait [#allocation8], 256  }
  0x26   :  { %616 = vsyncadd [#allocation8], 4294967040  ;;  %vm54_vm0 = vcmask 523264   ;;  %v623_v0 = vmov 0.0   ;;  %v67_v1 = vld [vmem:[#allocation4 + $0x20] sm:$0xff]  ;;  %v68_v3 = vld [vmem:[#allocation4 + $0x28] sm:$0xff]  ;;  %v150_v45 = vlaneseq }
  0x27   :  { %59 = vst.msk [vmem:[#allocation2 + $0x20] sm:$0xff] %vm54_vm0, %v623_v0  ;;  %55 = vst.msk [vmem:[#allocation2] sm:$0xff] %vm54_vm0, %v623_v0  ;;  %516 = vmatprep.subr.mxu1 %v623_v0  ;;  %v63_v2 = vld [vmem:[#allocation4] sm:$0xff]  ;;  %v64_v10 = vld [vmem:[#allocation4 + $0x8] sm:$0xff]  ;;  %vm198_vm1 = vcmask 261120   ;;  %v624_v44 = vmov 0.0|0.0  }
  0x28   :  { %56 = vst.msk [vmem:[#allocation2 + $0x8] sm:$0xff] %vm54_vm0, %v623_v0  ;;  %57 = vst.msk [vmem:[#allocation2 + $0x10] sm:$0xff] %vm54_vm0, %v623_v0  ;;  %v69_v12 = vld [vmem:[#allocation4 + $0x30] sm:$0xff]  ;;  %v70_v19 = vld [vmem:[#allocation4 + $0x38] sm:$0xff]  ;;  %526 = vmatprep.subr.bf16.mxu0 %v624_v44  ;;  %vm625_vm3 = vmmov 0   ;;  %vm49_vm4 = vcmask 123904  }
  0x29   :  { %58 = vst.msk [vmem:[#allocation2 + $0x18] sm:$0xff] %vm54_vm0, %v623_v0  ;;  %60 = vst.msk [vmem:[#allocation2 + $0x28] sm:$0xff] %vm54_vm0, %v623_v0  ;;  %v65_v15 = vld [vmem:[#allocation4 + $0x10] sm:$0xff]  ;;  %v66_v21 = vld [vmem:[#allocation4 + $0x18] sm:$0xff]  ;;  %513 = vmatprep.mubr.msk.f32.mxu0 %vm625_vm3, %v623_v0  ;;  %518 = vmatprep.mubr.msk.f32.mxu1 %vm625_vm3, %v623_v0  ;;  %v151_v48 = vand.u32 127, %v150_v45  ;;  %v713_v50 = vshrl.u32 %v150_v45, 7 }
  0x2a   :  { %61 = vst.msk [vmem:[#allocation2 + $0x30] sm:$0xff] %vm54_vm0, %v623_v0  ;;  %62 = vst.msk [vmem:[#allocation2 + $0x38] sm:$0xff] %vm54_vm0, %v623_v0  ;;  %v139_v41 = vld [vmem:[#allocation7] sm:$0xff]  ;;  %v140_v42 = vld [vmem:[#allocation7 + $0x8] sm:$0xff]  ;;  %vm161_vm5 = vcmask 130112   ;;  %vm168_vm6 = vcmask 195712  }
  0x2b   :  { %v527_v43 = vpack.c.bf16 %v140_v42, %v139_v41  ;;  %vm528_vm2 = vmpackc.low %vm198_vm1, %vm198_vm1  ;;  %50 = vst.msk [vmem:[#allocation3] sm:$0x3] %vm49_vm4, %v623_v0  ;;  %v156_v49 = vadd.s32 4294967288, %v151_v48  ;;  %v163_v53 = vadd.s32 4294967280, %v151_v48  ;;  %v170_v57 = vadd.s32 4294967272, %v151_v48 }
  0x2c   :  { %v154_v58 = vsub.s32 %v151_v48, %v713_v50  ;;  %vm175_vm7 = vcmask 261312   ;;  %vm196_vm8 = vcmask 1041409   ;;  %vm299_vm9 = vcmask 130048  }
  0x2d   :  { %529 = vmatpush3.bf16.xpose.msk.msra.mxu0 %vm528_vm2, %v527_v43  ;;  %v159_v54 = vsub.s32 %v156_v49, %v713_v50  ;;  %v166_v59 = vsub.s32 %v163_v53, %v713_v50  ;;  %v470_v49 = vsub.s32 0, %v713_v50  ;;  %vm476_vm14 = vcmask 9216  }
  0x2e   :  { %v75_v4 = vld [vmem:[#allocation2 + $0x20] sm:$0xff] }
  0x2f   :  { %v71_v5 = vld [vmem:[#allocation2] sm:$0xff]  ;;  %v83_v7 = vadd.f32 %v75_v4, %v67_v1  ;;  %v72_v11 = vld [vmem:[#allocation2 + $0x8] sm:$0xff]  ;;  %v73_v16 = vld [vmem:[#allocation2 + $0x10] sm:$0xff] }
  0x30   :  { %v76_v6 = vld [vmem:[#allocation2 + $0x28] sm:$0xff]  ;;  %v79_v8 = vadd.f32 %v71_v5, %v63_v2  ;;  %v80_v13 = vadd.f32 %v72_v11, %v64_v10  ;;  %v81_v18 = vadd.f32 %v73_v16, %v65_v15  ;;  %v74_v23 = vld [vmem:[#allocation2 + $0x18] sm:$0xff]  ;;  %v173_v5 = vsub.s32 %v170_v57, %v713_v50 }
  0x31   :  { %v84_v9 = vadd.f32 %v76_v6, %v68_v3  ;;  %v77_v14 = vld [vmem:[#allocation2 + $0x30] sm:$0xff]  ;;  %92 = vst.msk [vmem:[#allocation2 + $0x20] sm:$0xff] %vm54_vm0, %v83_v7  ;;  %v78_v20 = vld [vmem:[#allocation2 + $0x38] sm:$0xff]  ;;  %v82_v24 = vadd.f32 %v74_v23, %v66_v21 }
  0x32   :  { %88 = vst.msk [vmem:[#allocation2] sm:$0xff] %vm54_vm0, %v79_v8  ;;  %v85_v17 = vadd.f32 %v77_v14, %v69_v12  ;;  %89 = vst.msk [vmem:[#allocation2 + $0x8] sm:$0xff] %vm54_vm0, %v80_v13  ;;  %v86_v22 = vadd.f32 %v78_v20, %v70_v19  ;;  %v141_v23 = vld [vmem:[#allocation3] sm:$0x3] }
  0x33   :  { %93 = vst.msk [vmem:[#allocation2 + $0x28] sm:$0xff] %vm54_vm0, %v84_v9  ;;  %90 = vst.msk [vmem:[#allocation2 + $0x10] sm:$0xff] %vm54_vm0, %v81_v18 }
  0x34   :  { %94 = vst.msk [vmem:[#allocation2 + $0x30] sm:$0xff] %vm54_vm0, %v85_v17  ;;  %95 = vst.msk [vmem:[#allocation2 + $0x38] sm:$0xff] %vm54_vm0, %v86_v22 }
  0x35   :  { %91 = vst.msk [vmem:[#allocation2 + $0x18] sm:$0xff] %vm54_vm0, %v82_v24 }
  0x38   :  { %v103_v25 = vld [vmem:[#allocation2 + $0x20] sm:$0xff] }
  0x39   :  { %v99_v26 = vld [vmem:[#allocation2] sm:$0xff]  ;;  %v119_v28 = vsel %vm54_vm0, %v103_v25, 0.0  ;;  %v100_v30 = vld [vmem:[#allocation2 + $0x8] sm:$0xff] }
  0x3a   :  { %v104_v27 = vld [vmem:[#allocation2 + $0x28] sm:$0xff]  ;;  %v107_v29 = vsel %vm54_vm0, %v99_v26, 0.0  ;;  %120 = vadd.xlane.f32.xlu1 %v119_v28  ;;  %v110_v32 = vsel %vm54_vm0, %v100_v30, 0.0  ;;  %v101_v34 = vld [vmem:[#allocation2 + $0x10] sm:$0xff] }
  0x3b   :  { %108 = vadd.xlane.f32.xlu0 %v107_v29  ;;  %v122_v31 = vsel %vm54_vm0, %v104_v27, 0.0  ;;  %v105_v33 = vld [vmem:[#allocation2 + $0x30] sm:$0xff]  ;;  %v113_v36 = vsel %vm54_vm0, %v101_v34, 0.0  ;;  %v106_v37 = vld [vmem:[#allocation2 + $0x38] sm:$0xff]  ;;  %v497_v27 = vld [vmem:[%s746_s2] ss:$0 sm:$0xff] }
  0x3c   :  { %v125_v35 = vsel %vm54_vm0, %v105_v33, 0.0  ;;  %v102_v38 = vld [vmem:[#allocation2 + $0x18] sm:$0xff]  ;;  %v128_v39 = vsel %vm54_vm0, %v106_v37, 0.0  ;;  %s627_s2 = smov [#allocation9]  }
  0x3d   :  { %v116_v40 = vsel %vm54_vm0, %v102_v38, 0.0  ;;  %s484_s11 = sshll.u32 %s627_s2, 4  ;;  %s485_s11 = int_to_ptr.vmem [resolvable:$true] %s484_s11 }
  0x3e   :  { %123 = vadd.xlane.f32.xlu1 %v122_v31  ;;  %s591_s12 = scalar_lea.vmem %s485_s11, 32  ;;  %p596_p3 = scmp.lt.s32.totalorder %s485_s11, %s485_s11 }
  0x3f   :  { %111 = vadd.xlane.f32.xlu0 %v110_v32  ;;  %p592_p2 = scmp.ne.s32.totalorder %s485_s11, %s591_s12  ;;  %p597_p4 = scmp.lt.s32.totalorder %s591_s12, %s591_s12 }
  0x41   :  { %p598_p5 = por %p597_p4, %p596_p3 }
  0x42   :  { %126 = vadd.xlane.f32.xlu1 %v125_v35 }
  0x43   :  { %114 = vadd.xlane.f32.xlu0 %v113_v36  ;;  %p599_p6 = pnand %p598_p5, %p592_p2 }
  0x46   :  { %129 = vadd.xlane.f32.xlu1 %v128_v39  ;;  %v626_v39 = vmov 1.0  }
  0x47   :  { %117 = vadd.xlane.f32.xlu0 %v116_v40 }
  0xc7   :  { %v121_v46 = vpop.xlane.xlu1 %120 }
  0xc8   :  { %v109_v47 = vpop.xlane.xlu0 %108  ;;  %v135_v62 = vmul.f32 0.015625, %v121_v46 }
  0xc9   :  { %v131_v63 = vmul.f32 0.015625, %v109_v47 }
  0xca   :  { %v180_v10 = vrot.slane %v135_v62, %v154_v58 }
  0xcb   :  { %v124_v51 = vpop.xlane.xlu1 %123  ;;  %v155_v11 = vrot.slane %v131_v63, %v154_v58 }
  0xcc   :  { %v112_v52 = vpop.xlane.xlu0 %111  ;;  %v136_v55 = vmul.f32 0.015625, %v124_v51 }
  0xcd   :  { %v132_v56 = vmul.f32 0.015625, %v112_v52 }
  0xce   :  { %v184_v3 = vrot.slane %v136_v55, %v159_v54 }
  0xcf   :  { %v127_v60 = vpop.xlane.xlu1 %126  ;;  %v160_v4 = vrot.slane %v132_v56, %v159_v54 }
  0xd0   :  { %v115_v61 = vpop.xlane.xlu0 %114  ;;  %v137_v1 = vmul.f32 0.015625, %v127_v60  ;;  %v185_v14 = vsel %vm161_vm5, %v184_v3, %v180_v10 }
  0xd1   :  { %v133_v2 = vmul.f32 0.015625, %v115_v61  ;;  %v162_v15 = vsel %vm161_vm5, %v160_v4, %v155_v11 }
  0xd2   :  { %v189_v6 = vrot.slane %v137_v1, %v166_v59 }
  0xd3   :  { %v167_v7 = vrot.slane %v133_v2, %v166_v59  ;;  %v130_v8 = vpop.xlane.xlu1 %129 }
  0xd4   :  { %v118_v9 = vpop.xlane.xlu0 %117  ;;  %v138_v12 = vmul.f32 0.015625, %v130_v8  ;;  %v190_v18 = vsel %vm168_vm6, %v189_v6, %v185_v14 }
  0xd5   :  { %v134_v13 = vmul.f32 0.015625, %v118_v9  ;;  %v169_v19 = vsel %vm168_vm6, %v167_v7, %v162_v15 }
  0xd6   :  { %v194_v16 = vrot.slane %v138_v12, %v173_v5 }
  0xd7   :  { %v174_v17 = vrot.slane %v134_v13, %v173_v5 }
  0xd8   :  { %v195_v21 = vsel %vm175_vm7, %v194_v16, %v190_v18 }
  0xd9   :  { %v176_v20 = vsel %vm175_vm7, %v174_v17, %v169_v19 }
  0xda   :  { %v197_v22 = vsel %vm196_vm8, %v195_v21, %v176_v20 }
  0xdb   :  { %514 = vmatmul.mubr.msk.f32.vlgmr.msra.gmra.mrb[0].mxu0 %vm198_vm1, %v197_v22 }
 0x1ae   :  { %v273_v24 = vpop.f32.mrb[0].mxu0 }
 0x1af   :  { %v277_v25 = vadd.f32 %v273_v24, %v141_v23  ;;  %v515_v26 = vpop.f32.mrb[1].mxu0 }
 0x1b1   :  { %279 = vst.msk [vmem:[#allocation3] sm:$0x3] %vm49_vm4, %v277_v25 }
 0x1b8   :  { %v282_v28 = vld [vmem:[#allocation3] sm:$0x3] }
 0x1b9   :  { %v290_v29 = vadd.f32 %v497_v27, %v282_v28 }
 0x1bb   :  { %v291_v30 = vmul.f32 %v290_v29, %v290_v29 }
 0x1bd   :  { %v293_v31 = vsel %vm49_vm4, %v291_v30, 0.0 }
 0x1be   :  { %294 = vadd.xlane.f32.xlu0 %v293_v31 }
 0x24b   :  { %v295_v32 = vpop.xlane.xlu0 %294 }
 0x24c   :  { %v296_v33 = vmax.f32 %v295_v32, 1e-24 }
 0x24e   :  { %539 = vrsqrt.f32 %v296_v33 }
 0x258   :  { %v540_v34 = vpop.eup %539 }
 0x259   :  { %v298_v35 = vmul.f32 %v540_v34, %v290_v29 }
 0x25b   :  { %517 = vmatpush3.xpose.msk.msra.mxu1 %vm299_vm9, %v298_v35  ;;  %v373_v36 = vadd.f32 1e-06, %v298_v35 }
 0x25c   :  { %521 = vmatprep.subr.mxu1 %v623_v0 }
 0x25d   :  { %v374_v37 = vmul.f32 %v373_v36, %v373_v36 }
 0x25e   :  { %519 = vmatmul.mubr.msk.f32.vlgmr.msra.gmra.mrb[0].mxu1 %vm299_vm9, %v298_v35 }
 0x25f   :  { %522 = vmatpush3.xpose.msk.msra.mxu1 %vm299_vm9, %v374_v37  ;;  %v375_v38 = vsel %vm49_vm4, %v374_v37, 0.0  ;;  %523 = vmatprep.mubr.msk.f32.mxu1 %vm625_vm3, %v623_v0 }
 0x260   :  { %376 = vadd.xlane.f32.xlu1 %v375_v38 }
 0x262   :  { %524 = vmatmul.mubr.msk.f32.vlgmr.msra.gmra.mrb[2].mxu1 %vm299_vm9, %v626_v39 }
 0x2ed   :  { %v377_v40 = vpop.xlane.xlu1 %376 }
 0x2ee   :  { %541 = vrsqrt.f32 %v377_v40  ;;  %vm380_vm10 = vcmp.eq.f32.partialorder %v377_v40, inf  ;;  %v383_v53 = vand.u32 2147483648, %v377_v40  ;;  %vm382_vm13 = vcmp.eq.f32.partialorder %v377_v40, 0.0 }
 0x2f8   :  { %v542_v45 = vpop.eup %541 }
 0x2f9   :  { %v379_v46 = vmul.f32 %v542_v45, %v377_v40 }
 0x2fb   :  { %v381_v0 = vsel %vm380_vm10, %v377_v40, %v379_v46 }
 0x2fc   :  { %v384_v56 = vsel %vm382_vm13, %v383_v53, %v381_v0 }
 0x331   :  { %v369_v41 = vpop.f32.mrb[0].mxu1 }
 0x332   :  { %v520_v42 = vpop.f32.mrb[1].mxu1 }
 0x335   :  { %v457_v43 = vpop.f32.mrb[2].mxu1 }
 0x336   :  { %543 = vrsqrt.f32 %v457_v43  ;;  %v525_v44 = vpop.f32.mrb[3].mxu1  ;;  %vm463_vm11 = vcmp.eq.f32.partialorder %v457_v43, inf  ;;  %v466_v51 = vand.u32 2147483648, %v457_v43  ;;  %vm465_vm12 = vcmp.eq.f32.partialorder %v457_v43, 0.0 }
 0x340   :  { %v544_v47 = vpop.eup %543 }
 0x341   :  { %v462_v48 = vmul.f32 %v544_v47, %v457_v43 }
 0x343   :  { %v464_v52 = vsel %vm463_vm11, %v457_v43, %v462_v48 }
 0x344   :  { %v467_v54 = vsel %vm465_vm12, %v466_v51, %v464_v52 }
 0x345   :  { %v471_v55 = vrot.slane %v467_v54, %v470_v49 }
 0x347   :  { %v472_v57 = vmax.f32 %v384_v56, %v471_v55 }
 0x349   :  { %v473_v58 = vmax.f32 %v472_v57, 1e-08 }
 0x34b   :  { %545 = vrcp.f32 %v473_v58 }
 0x355   :  { %v546_v59 = vpop.eup %545 }
 0x356   :  { %v475_v60 = vmul.f32 %v546_v59, %v369_v41 }
 0x358   :  { %477 = vst.msk [vmem:[#allocation9] sm:$0x3] %vm476_vm14, %v475_v60 }
 0x359   :  { %602 = shalt.err (!%p599_p6)
}
 0x35a   :  { %s603_s15 = scalar_lea.hbm %s747_s3, 32 }
 0x35b   :  { %p604_p7 = scmp.ne.s32.totalorder %s747_s3, %s603_s15  ;;  %p607_p8 = scmp.lt.u32.totalorder %s603_s15, %s747_s3 }
 0x35d   :  { %p609_p9 = pnand %p607_p8, %p604_p7 }
 0x35f   :  { %612 = shalt.err (!%p609_p9)
}
 0x360   :  { %487 = dma.vmem_to_hbm [thread:$0]  %s485_s11, 32, %s747_s3, [#allocation6]  }
 0x361   :  { %617 = dma.done.wait [#allocation6], 32  }
 0x362   :  { %618 = vsyncadd [#allocation6], 4294967264 }
 0x363   :  { %491 = vsyncpa [#allocation5], 1 }
 0x364   :  { %492 = vsyncpa [#allocation8], 1 }
 0x365   :  { %493 = vsyncpa [#allocation6], 1 }

</bundles_post_ra>
